<compile_context>
chip_gen: v5e
topology: v5e:2x2
jax: 0.10.0
libtpu: 0.0.40
codegen_flags: <defaults>
</compile_context>

<pallas_src>
import functools
from typing import NamedTuple

import jax
import jax.numpy as jnp
from jax.experimental import pallas as pl
from jax.experimental.pallas import tpu as pltpu


def _round_up(x, m):
    return (x + m - 1) // m * m


class PreparedMixEmbedding(NamedTuple):
    table: jax.Array   # [v_tot_pad, emb_pad]: char rows, then projected word rows, zero-padded
    vc_off: int        # word id v lives at combined row (vc_off + v)
    emb_dim: int       # un-padded embedding dim


def prepare_mix_embedding(word2vec_table, char_table, w_dense, *,
                          table_dtype=jnp.bfloat16):
    """One-time prep (hoisted out of the per-call path).

    Folds the bias-free Linear into the word table (proj = table @ W^T),
    concatenates it with the char table, pads to MXU/lane-friendly shapes and
    casts to the resident dtype (bf16 by default; one-hot selection stays exact,
    table rounding is ~1e-3 relative — pass table_dtype=jnp.float32 if needed).
    """
    emb_dim = char_table.shape[1]
    assert w_dense.shape == (emb_dim, word2vec_table.shape[1])
    proj = jnp.dot(word2vec_table.astype(jnp.float32),
                   w_dense.astype(jnp.float32).T,
                   preferred_element_type=jnp.float32)          # [Vw, emb_dim]
    comb = jnp.concatenate([char_table.astype(jnp.float32), proj], axis=0)
    v_tot = comb.shape[0]
    v_tot_pad = _round_up(v_tot, 128)
    emb_pad = _round_up(emb_dim, 128)
    comb = jnp.pad(comb, ((0, v_tot_pad - v_tot), (0, emb_pad - emb_dim)))
    return PreparedMixEmbedding(comb.astype(table_dtype),
                                int(char_table.shape[0]), int(emb_dim))


def _mix_kernel(ids_ref, tab_ref, out_ref, *, vc_off):
    # ids_ref : (TM, 2) int32  — column 0 = char ids, column 1 = word ids
    # tab_ref : (V_tot_pad, emb_pad) resident combined table (bf16/f32)
    # out_ref : (TM, emb_pad) f32
    tm = out_ref.shape[0]
    v_tot = tab_ref.shape[0]

    ids = ids_ref[...]                                   # (TM, 2)
    cids = ids[:, 0:1]                                    # (TM, 1)
    wids = ids[:, 1:2] + vc_off                           # (TM, 1)

    # Single combined one-hot gather via one MXU matmul.  One-hot values are
    # 0/1, so casting to bf16 is exact; padded/out-of-range ids select zero rows.
    iota = jax.lax.broadcasted_iota(jnp.int32, (tm, v_tot), 1)
    onehot = jnp.logical_or(iota == cids, iota == wids).astype(tab_ref.dtype)
    out_ref[...] = jnp.dot(onehot, tab_ref[...],
                           preferred_element_type=jnp.float32).astype(out_ref.dtype)


def mix_embedding_forward(char_ids, word_ids, prepared: PreparedMixEmbedding, *,
                          tm=2048):
    """char_ids, word_ids: int [B, S].  Returns float32 [B, S, emb_dim]."""
    B, S = char_ids.shape
    table = prepared.table
    v_tot_pad, emb_pad = table.shape
    emb_dim = prepared.emb_dim
    N = B * S
    tab_itemsize = jnp.dtype(table.dtype).itemsize

    # TODO(synk): switch to a scalar-prefetch / DMA row-gather kernel when
    # v_tot_pad is large (>~8k rows); the one-hot path below is for small tables.

    # --- token tile selection ---
    #  * bound the (tm, V) one-hot intermediate to ~8 MB,
    #  * keep >= 2 grid steps once N is non-trivial so v7x's 2 TCs both get work,
    #  * clamp/round for ragged or tiny N.
    tm = min(tm, max(256, ((8 << 20) // (v_tot_pad * 2)) // 8 * 8))
    if N > 2048:
        tm = min(tm, _round_up(-(-N // 2), 8))
    tm = max(8, min(_round_up(tm, 8), _round_up(N, 8)))
    n_pad = _round_up(N, tm)
    grid = (n_pad // tm,)

    # --- merged id stream: one (N, 2) int32 input instead of two ---
    ids = jnp.stack([char_ids.reshape(N).astype(jnp.int32),
                     word_ids.reshape(N).astype(jnp.int32)], axis=1)   # (N, 2)
    if n_pad != N:
        ids = jnp.pad(ids, ((0, n_pad - N), (0, 0)))   # padded rows sliced off below

    # --- VMEM budget: single-buffered table + double-buffered streamed blocks
    #     + in-kernel intermediates, with ~1.5x headroom (v5e default is 16 MiB). ---
    est = (v_tot_pad * emb_pad * tab_itemsize            # resident table (x1)
           + 2 * (tm * 128 * 4)                          # ids block (lane-padded), x2 buffers
           + 2 * (tm * emb_pad * 4)                      # out block, x2 buffers
           + tm * v_tot_pad * (4 + tab_itemsize)         # iota / one-hot intermediates
           + tm * emb_pad * 4)                           # f32 matmul result
    vmem_limit = int(min(100 << 20, max(32 << 20, est * 3 // 2)))

    cost = pl.CostEstimate(
        flops=2 * n_pad * v_tot_pad * emb_pad,
        transcendentals=0,
        bytes_accessed=(n_pad * 2 * 4                      # ids in
                        + n_pad * emb_pad * 4              # output
                        + v_tot_pad * emb_pad * tab_itemsize),  # resident table
    )

    out = pl.pallas_call(
        functools.partial(_mix_kernel, vc_off=prepared.vc_off),
        out_shape=jax.ShapeDtypeStruct((n_pad, emb_pad), jnp.float32),
        grid_spec=pltpu.PrefetchScalarGridSpec(
            num_scalar_prefetch=0,
            grid=grid,
            in_specs=[
                pl.BlockSpec((tm, 2), lambda i: (i, 0)),              # fused char/word ids
                pl.BlockSpec(memory_space=pltpu.MemorySpace.VMEM),    # whole table, resident, single-buffered
            ],
            out_specs=pl.BlockSpec((tm, emb_pad), lambda i: (i, 0)),
        ),
        compiler_params=pltpu.CompilerParams(
            dimension_semantics=("parallel",),
            vmem_limit_bytes=vmem_limit),
        cost_estimate=cost,
    )(ids, table)

    return out[:N, :emb_dim].reshape(B, S, emb_dim)


def make_params(key, *, word_vocab, word_size, char_vocab, emb_dim):
    """Deterministic synthetic parameters mirroring MixEmbedding.__init__."""
    k1, k2, k3 = jax.random.split(key, 3)
    # word2vec table: pretrained vectors with a zero row prepended (index 0 = pad)
    w2v = jax.random.normal(k1, (word_vocab, word_size), jnp.float32)
    word2vec_table = jnp.concatenate(
        [jnp.zeros((1, word_size), jnp.float32), w2v], axis=0)   # [word_vocab+1, word_size]
    # char embedding: N(0, 0.1), padding_idx=0 row zeroed
    char_table = 0.1 * jax.random.normal(k2, (char_vocab, emb_dim), jnp.float32)
    char_table = char_table.at[0].set(0.0)
    # word_dense: xavier_uniform over [emb_dim, word_size]
    limit = float(jnp.sqrt(6.0 / (emb_dim + word_size)))
    w_dense = jax.random.uniform(k3, (emb_dim, word_size), jnp.float32,
                                 minval=-limit, maxval=limit)
    return word2vec_table, char_table, w_dense


if __name__ == "__main__":
    key = jax.random.PRNGKey(0)
    B, S = 2, 8
    word_vocab, word_size = 50, 32
    char_vocab, emb_dim = 64, 128

    kp, kc, kw = jax.random.split(key, 3)
    word2vec_table, char_table, w_dense = make_params(
        kp, word_vocab=word_vocab, word_size=word_size,
        char_vocab=char_vocab, emb_dim=emb_dim)

    char_ids = jax.random.randint(kc, (B, S), 0, char_vocab, dtype=jnp.int32)
    word_ids = jax.random.randint(kw, (B, S), 0, word_vocab + 1, dtype=jnp.int32)

    # one-time prep (hoisted out of the per-call path), then the fused kernel
    prepared = prepare_mix_embedding(word2vec_table, char_table, w_dense)
    out = mix_embedding_forward(char_ids, word_ids, prepared)
    out = jax.block_until_ready(out)
    assert out.shape == (B, S, emb_dim)

    # 1) Exact check: gather through the same bf16-rounded combined table
    #    (one-hot MXU selection of 0/1 rows is exact).
    comb_f32 = prepared.table.astype(jnp.float32)[:, :emb_dim]
    ref_exact = (jnp.take(comb_f32, char_ids, axis=0)
                 + jnp.take(comb_f32, word_ids + prepared.vc_off, axis=0))
    assert jnp.allclose(out, ref_exact, atol=1e-5, rtol=1e-5)

    # 2) Module-level f32 semantics (loose tolerance: bf16 table rounding ~1e-3 rel).
    ref_f32 = (jnp.take(char_table, char_ids, axis=0)
               + jnp.einsum("bsw,ew->bse",
                            jnp.take(word2vec_table, word_ids, axis=0), w_dense))
    assert jnp.allclose(out, ref_f32, atol=0.1, rtol=0.05)

    print("KERNEL_OK")
</pallas_src>

<mosaic_0001>
module attributes {stable_mosaic.version = 11 : i64} {
  func.func @_mix_kernel(%arg0: i32, %arg1: memref<16x2xi32, #tpu.memory_space<vmem>>, %arg2: memref<128x128xbf16, #tpu.memory_space<vmem>>, %arg3: memref<16x128xf32, #tpu.memory_space<vmem>>) attributes {dimension_semantics = [#tpu.dimension_semantics<parallel>], iteration_bounds = array<i64: 1>, scalar_prefetch = 0 : i64, scratch_operands = 0 : i64, tpu.core_type = #tpu.core_type<tc>, window_params = [{transform_indices = @transform_0, window_bounds = array<i64: 16, 2>}, {pipeline_mode = #tpu.pipeline_mode<synchronous>, transform_indices = @transform_1, window_bounds = array<i64: 128, 128>}, {transform_indices = @transform_2, window_bounds = array<i64: 16, 128>}]} {
    %c0 = arith.constant 0 : index
    %c0_0 = arith.constant 0 : index
    %0 = vector.load %arg1[%c0, %c0_0] : memref<16x2xi32, #tpu.memory_space<vmem>>, vector<16x2xi32>
    %1 = vector.extract_strided_slice %0 {offsets = [0, 0], sizes = [16, 1], strides = [1, 1]} : vector<16x2xi32> to vector<16x1xi32>
    %2 = vector.extract_strided_slice %0 {offsets = [0, 1], sizes = [16, 1], strides = [1, 1]} : vector<16x2xi32> to vector<16x1xi32>
    %c64_i32 = arith.constant 64 : i32
    %3 = vector.broadcast %c64_i32 : i32 to vector<16x1xi32>
    %4 = arith.addi %2, %3 : vector<16x1xi32>
    %5 = tpu.iota {dimensions = array<i32: 1>} : vector<16x128xi32>
    %6 = vector.broadcast %1 : vector<16x1xi32> to vector<16x128xi32>
    %7 = arith.cmpi eq, %5, %6 : vector<16x128xi32>
    %8 = vector.broadcast %4 : vector<16x1xi32> to vector<16x128xi32>
    %9 = arith.cmpi eq, %5, %8 : vector<16x128xi32>
    %10 = arith.ori %7, %9 : vector<16x128xi1>
    %11 = arith.extui %10 : vector<16x128xi1> to vector<16x128xi32>
    %12 = arith.sitofp %11 : vector<16x128xi32> to vector<16x128xf32>
    %13 = arith.truncf %12 : vector<16x128xf32> to vector<16x128xbf16>
    %c0_1 = arith.constant 0 : index
    %c0_2 = arith.constant 0 : index
    %14 = vector.load %arg2[%c0_1, %c0_2] : memref<128x128xbf16, #tpu.memory_space<vmem>>, vector<128x128xbf16>
    %cst = arith.constant dense<0.000000e+00> : vector<16x128xf32>
    %15 = tpu.matmul %13, %14, %cst {dimension_numbers = #tpu.dot_dimension_numbers<[1], [0], [0], [1], [0, 0, 1, 1], [], []>} : vector<16x128xbf16>, vector<128x128xbf16>, vector<16x128xf32> -> vector<16x128xf32>
    %c0_3 = arith.constant 0 : index
    %c0_4 = arith.constant 0 : index
    %16 = vector.load %arg3[%c0_3, %c0_4] : memref<16x128xf32, #tpu.memory_space<vmem>>, vector<16x128xf32>
    tpu.vector_store %arg3[%c0_3, %c0_4], %15 {strides = array<i32>} : memref<16x128xf32, #tpu.memory_space<vmem>>, vector<16x128xf32>,
    return
  }
  func.func @transform_0(%arg0: i32) -> (i32, i32) {
    %c0_i32 = arith.constant 0 : i32
    %c0_i32_0 = arith.constant 0 : i32
    return %arg0, %c0_i32 : i32, i32
  }
  func.func @transform_1(%arg0: i32) -> (i32, i32) {
    %c0_i32 = arith.constant 0 : i32
    %c0_i32_0 = arith.constant 0 : i32
    %c0_i32_1 = arith.constant 0 : i32
    return %c0_i32, %c0_i32_0 : i32, i32
  }
  func.func @transform_2(%arg0: i32) -> (i32, i32) {
    %c0_i32 = arith.constant 0 : i32
    %c0_i32_0 = arith.constant 0 : i32
    return %arg0, %c0_i32 : i32, i32
  }
}

</mosaic_0001>

<bundles_post_ra>
// kernel: tpu_custom_call.1
= control target key start
LH: loop header
LB: loop body
LE: loop exit
PB: predicated region body
PF: predicated region fallthrough
CT: control target
= control target key end

     0   :  { %7 = vsyncpa [#allocation3], 0  ;;  %s300_s0 = inlined_call_operand.vmem [shape: s32[16,2], index: 0, kind: input, shape index: {}]   ;;  %s301_s1 = inlined_call_operand.hbm [shape: bf16[128,128], index: 1, kind: input, shape index: {}]   ;;  %s302_s2 = inlined_call_operand.hbm [shape: f32[16,128], index: 2, kind: output, shape index: {}]  }
   0x1   :  { %8 = vsyncpa [#allocation4], 0  ;;  %s15_s11 = sshll.u32 %s301_s1, 4  ;;  %s264_s12 = smov [#allocation2]   ;;  %s16_s11 = int_to_ptr.hbm [resolvable:$true] %s15_s11 }
   0x2   :  { %s17_s13 = sshll.u32 %s264_s12, 4  ;;  %s265_s14 = smov 64   ;;  %s18_s13 = int_to_ptr.vmem [resolvable:$true] %s17_s13 }
   0x3   :  { %s266_s15 = smov 4  }
   0x4   :  { %23 = dma.hbm_to_vmem [thread:$0]  %s16_s11, 1024, %s18_s13, [#allocation3], %s265_s14, %s265_s14, %s266_s15  }
   0x5   :  { %260 = dma.done.wait [#allocation3], 1024  }
   0x6   :  { %261 = vsyncadd [#allocation3], 4294966272  ;;  %v267_v0 = vmov 0   ;;  %v268_v1 = vmov 1   ;;  %v28_v2 = vld [vmem:[%s300_s0] sm:$0xff]  ;;  %v199_v3 = vld [vmem:[#allocation2 + $0x38] sm:$0xff]  ;;  %v32_v14 = vlaneseq }
   0x7   :  { %209 = vset.pattern.permute.xlu0 %v267_v0  ;;  %210 = vset.pattern.permute.xlu1 %v268_v1  ;;  %v30_v4 = vadd.s32 64, %v28_v2  ;;  %v198_v5 = vld [vmem:[#allocation2 + $0x30] sm:$0xff]  ;;  %v29_v6 = vld [vmem:[%s300_s0 + $0x8] sm:$0xff]  ;;  %v196_v9 = vld [vmem:[#allocation2 + $0x20] sm:$0xff]  ;;  %v269_v20 = vmov 1.0|1.0  }
   0x8   :  { %35 = vperm.xlu0 %209, %v28_v2   ;;  %121 = vmatpush.bf16.msra.mxu0 %v199_v3  ;;  %v197_v7 = vld [vmem:[#allocation2 + $0x28] sm:$0xff]  ;;  %v31_v8 = vadd.s32 64, %v29_v6  ;;  %v195_v10 = vld [vmem:[#allocation2 + $0x18] sm:$0xff]  ;;  %v194_v11 = vld [vmem:[#allocation2 + $0x10] sm:$0xff]  ;;  %v33_v17 = vand.u32 127, %v32_v14  ;;  %s270_s0 = smov [#allocation5]  }
   0x9   :  { %43 = vperm.xlu1 %210, %v30_v4   ;;  %v193_v12 = vld [vmem:[#allocation2 + $0x8] sm:$0xff]  ;;  %v192_v13 = vld [vmem:[#allocation2] sm:$0xff]  ;;  %s141_s19 = sshll.u32 %s270_s0, 4  ;;  %s143_s22 = sshll.u32 %s302_s2, 4  ;;  %s142_s19 = int_to_ptr.vmem [resolvable:$true] %s141_s19  ;;  %s144_s22 = int_to_ptr.hbm [resolvable:$true] %s143_s22 }
   0xa   :  { %s271_s23 = smov 128   ;;  %s272_s24 = smov 8  }
   0xc   :  { %122 = vmatpush.bf16.msra.mxu0 %v198_v5 }
  0x10   :  { %38 = vperm.xlu0 %209, %v29_v6   ;;  %123 = vmatpush.bf16.msra.mxu0 %v197_v7 }
  0x11   :  { %46 = vperm.xlu1 %210, %v31_v8  }
  0x14   :  { %124 = vmatpush.bf16.msra.mxu0 %v196_v9 }
  0x18   :  { %211 = vset.pattern.permute.xlu0 %v268_v1  ;;  %125 = vmatpush.bf16.msra.mxu0 %v195_v10 }
  0x1c   :  { %126 = vmatpush.bf16.msra.mxu0 %v194_v11 }
  0x20   :  { %127 = vmatpush.bf16.msra.mxu0 %v193_v12 }
  0x24   :  { %128 = vmatpush.bf16.msra.mxu0 %v192_v13 }
  0x7a   :  { %v36_v15 = vpop.permute.xlu0 %35 }
  0x7b   :  { %v44_v16 = vpop.permute.xlu1 %43  ;;  %vm40_vm0 = vcmp.eq.s32.totalorder %v33_v17, %v36_v15 }
  0x7c   :  { %vm48_vm1 = vcmp.eq.s32.totalorder %v33_v17, %v44_v16 }
  0x7d   :  { %vm50_vm2 = vmor %vm40_vm0, %vm48_vm1 }
  0x82   :  { %v39_v18 = vpop.permute.xlu0 %38 }
  0x83   :  { %v47_v19 = vpop.permute.xlu1 %46  ;;  %vm41_vm3 = vcmp.eq.s32.totalorder %v33_v17, %v39_v18 }
  0x84   :  { %vm49_vm4 = vcmp.eq.s32.totalorder %v33_v17, %v47_v19 }
  0x85   :  { %vm51_vm5 = vmor %vm41_vm3, %vm49_vm4 }
  0x86   :  { %vm190_vm6 = vmpackc.low %vm51_vm5, %vm50_vm2 }
  0x87   :  { %191 = vmatmul.msk.bf16.vlgmr.msra.gmra.mxu0 %vm190_vm6, %v269_v20 }
 0x104   :  { %v130_v21 = vpop.f32.mrf.mxu0 }
 0x105   :  { %135 = vst [vmem:[#allocation5] sm:$0xff] %v130_v21 }
 0x10c   :  { %v132_v22 = vpop.f32.mrf.mxu0 }
 0x10d   :  { %136 = vst [vmem:[#allocation5 + $0x8] sm:$0xff] %v132_v22 }
 0x10e   :  { %149 = dma.vmem_to_hbm [thread:$0]  %s142_s19, 256, %s144_s22, [#allocation4], %s271_s23, %s271_s23, %s272_s24  }
 0x10f   :  { %262 = dma.done.wait [#allocation4], 256  }
 0x110   :  { %263 = vsyncadd [#allocation4], 4294967040 }
 0x111   :  { %154 = vsyncpa [#allocation3], 1 }
 0x112   :  { %155 = vsyncpa [#allocation4], 1 }

</bundles_post_ra>
